<compile_context>
chip_gen: v6e
topology: v6e:2x2x1
jax: 0.10.0
libtpu: 0.0.40
codegen_flags: <defaults>
</compile_context>

<pallas_src>
import numpy as np
import jax
import jax.numpy as jnp
from jax.experimental import pallas as pl
from jax.experimental.pallas import tpu as pltpu


# ----------------------------------------------------------------------------
# small helpers
# ----------------------------------------------------------------------------
def _round_up(x, m):
    return ((x + m - 1) // m) * m


def _divisor_tile(total, target, step=8):
    """Largest multiple of `step` that divides `total` and is <= max(step, target)."""
    if total <= step:
        return total
    t = min(total, target)
    t -= t % step
    t = max(t, step)
    while total % t:
        t -= step
    return t


def _pad_gate_last(a, c, c_p):
    """Pad the last axis (..., 4*c) -> (..., 4*c_p) per gate block (i,f,g,o)."""
    lead = a.shape[:-1]
    a4 = a.reshape(lead + (4, c))
    a4 = jnp.pad(a4, [(0, 0)] * len(lead) + [(0, 0), (0, c_p - c)])
    return a4.reshape(lead + (4 * c_p,))


# ----------------------------------------------------------------------------
# Pallas kernel 1: big fused linear  y = x @ W + b  (hoisted input projection).
# Tiled over rows; W/bias blocks are grid-constant; output is lane-dense.
# ----------------------------------------------------------------------------
def _linear_kernel(x_ref, w_ref, b_ref, o_ref):
    acc = jnp.dot(x_ref[...], w_ref[...], preferred_element_type=jnp.float32)
    o_ref[...] = (acc + b_ref[...]).astype(o_ref.dtype)


def linear_pallas(x, w, b_f32, *, out_dtype, row_tile_target=512):
    n, d_in = x.shape
    d_out = w.shape[1]
    row_tile = _divisor_tile(n, row_tile_target)
    # TODO(synk): no K-dim tiling; assumes (d_in x d_out) weight fits VMEM.
    return pl.pallas_call(
        _linear_kernel,
        out_shape=jax.ShapeDtypeStruct((n, d_out), out_dtype),
        grid_spec=pltpu.PrefetchScalarGridSpec(
            num_scalar_prefetch=0,
            grid=(n // row_tile,),
            in_specs=[
                pl.BlockSpec((row_tile, d_in), lambda i: (i, 0)),
                pl.BlockSpec((d_in, d_out), lambda i: (0, 0)),
                pl.BlockSpec((1, d_out), lambda i: (0, 0)),
            ],
            out_specs=pl.BlockSpec((row_tile, d_out), lambda i: (i, 0)),
        ),
        compiler_params=pltpu.CompilerParams(dimension_semantics=("parallel",)),
    )(x, w, b_f32)


# ----------------------------------------------------------------------------
# Pallas kernel 2: LSTM recurrence over precomputed input gates.
# grid = (batch_blocks [parallel], time_blocks [arbitrary]).
# Per grid step: TT timesteps unrolled; only h @ W_hh on the serial path.
# W_hh is DMA'd once per batch block into VMEM scratch (single residency).
# ----------------------------------------------------------------------------
def _lstm_recurrence_kernel(gx_ref, whh_hbm_ref, y_ref,
                            whh_vmem, h_scr, c_scr, dma_sem):
    ts = pl.program_id(1)

    @pl.when(ts == 0)
    def _():
        cp = pltpu.make_async_copy(whh_hbm_ref, whh_vmem, dma_sem)
        cp.start()
        cp.wait()
        h_scr[...] = jnp.zeros_like(h_scr)
        c_scr[...] = jnp.zeros_like(c_scr)

    tt = gx_ref.shape[0]          # timesteps in this block
    c_dim = h_scr.shape[1]        # padded cell dim (multiple of 128)

    def step(k, carry):
        gates = gx_ref[k].astype(jnp.float32) + jnp.dot(
            h_scr[...].astype(whh_vmem.dtype), whh_vmem[...],
            preferred_element_type=jnp.float32)          # (BB, 4*C_p)
        i = jax.nn.sigmoid(gates[:, 0:c_dim])
        f = jax.nn.sigmoid(gates[:, c_dim:2 * c_dim])
        g = jnp.tanh(gates[:, 2 * c_dim:3 * c_dim])
        o = jax.nn.sigmoid(gates[:, 3 * c_dim:4 * c_dim])
        c_new = f * c_scr[...] + i * g
        h_new = o * jnp.tanh(c_new)
        c_scr[...] = c_new
        h_scr[...] = h_new
        y_ref[k] = h_new.astype(y_ref.dtype)
        return carry

    jax.lax.fori_loop(0, tt, step, 0, unroll=True)


def lstm_recurrence_pallas(gates_x, whh_p, *, time_block, n_batch_blocks, out_dtype):
    t_p, b_p, g4 = gates_x.shape
    c_p = g4 // 4
    bb = b_p // n_batch_blocks
    return pl.pallas_call(
        _lstm_recurrence_kernel,
        out_shape=jax.ShapeDtypeStruct((t_p, b_p, c_p), out_dtype),
        grid_spec=pltpu.PrefetchScalarGridSpec(
            num_scalar_prefetch=0,
            grid=(n_batch_blocks, t_p // time_block),
            in_specs=[
                pl.BlockSpec((time_block, bb, g4), lambda nb, ts: (ts, nb, 0)),
                pl.BlockSpec(memory_space=pl.ANY),      # W_hh stays in HBM; manual DMA
            ],
            out_specs=pl.BlockSpec((time_block, bb, c_p), lambda nb, ts: (ts, nb, 0)),
            scratch_shapes=[
                pltpu.VMEM((c_p, g4), whh_p.dtype),     # resident recurrent weight
                pltpu.VMEM((bb, c_p), jnp.float32),     # h state (f32)
                pltpu.VMEM((bb, c_p), jnp.float32),     # c state (f32)
                pltpu.SemaphoreType.DMA(()),
            ],
        ),
        compiler_params=pltpu.CompilerParams(
            dimension_semantics=("parallel", "arbitrary")),
    )(gates_x, whh_p)


# ----------------------------------------------------------------------------
# Pallas kernel 3: mask(by ilens) * ys, then tanh(Linear(cdim -> hdim)).
# Mask is built in-kernel from scalar-prefetched ilens (SMEM); output lane-dense.
# ----------------------------------------------------------------------------
def _masked_proj_kernel(lens_ref, y_ref, w_ref, b_ref, o_ref):
    b = pl.program_id(0)
    t_blk = pl.program_id(1)
    t_tile = y_ref.shape[1]
    t_ids = t_blk * t_tile + jax.lax.broadcasted_iota(jnp.int32, (t_tile, 1), 0)
    valid = t_ids < lens_ref[b]
    y = jnp.where(valid, y_ref[0], jnp.zeros((), y_ref.dtype))
    acc = jnp.dot(y, w_ref[...], preferred_element_type=jnp.float32) + b_ref[...]
    o_ref[0] = jnp.tanh(acc).astype(o_ref.dtype)


def masked_projection_pallas(lens, ys, w_p, b_f32, *, t_tile, out_dtype=jnp.float32):
    b_p, t_p, c_p = ys.shape
    h_p = w_p.shape[1]
    return pl.pallas_call(
        _masked_proj_kernel,
        out_shape=jax.ShapeDtypeStruct((b_p, t_p, h_p), out_dtype),
        grid_spec=pltpu.PrefetchScalarGridSpec(
            num_scalar_prefetch=1,
            grid=(b_p, t_p // t_tile),
            in_specs=[
                pl.BlockSpec((1, t_tile, c_p), lambda b, t, lens_ref: (b, t, 0)),
                pl.BlockSpec((c_p, h_p), lambda b, t, lens_ref: (0, 0)),
                pl.BlockSpec((1, h_p), lambda b, t, lens_ref: (0, 0)),
            ],
            out_specs=pl.BlockSpec((1, t_tile, h_p), lambda b, t, lens_ref: (b, t, 0)),
        ),
        compiler_params=pltpu.CompilerParams(
            dimension_semantics=("parallel", "parallel")),
    )(lens, ys, w_p, b_f32)


# ----------------------------------------------------------------------------
# Parameters + forward wrapper.
# ----------------------------------------------------------------------------
def init_params(key, idim, elayers, cdim, hdim):
    params = {"lstm": []}
    scale = 1.0 / np.sqrt(cdim)
    for layer in range(elayers):
        in_dim = idim if layer == 0 else cdim
        key, k1, k2, k3, k4 = jax.random.split(key, 5)
        wih_t = jax.random.uniform(k1, (in_dim, 4 * cdim), jnp.float32, -scale, scale)
        whh_t = jax.random.uniform(k2, (cdim, 4 * cdim), jnp.float32, -scale, scale)
        b_ih = jax.random.uniform(k3, (4 * cdim,), jnp.float32, -scale, scale)
        b_hh = jax.random.uniform(k4, (4 * cdim,), jnp.float32, -scale, scale)
        params["lstm"].append((wih_t, whh_t, (b_ih + b_hh).reshape(1, 4 * cdim)))
    key, k5, k6 = jax.random.split(key, 3)
    params["l_last_w_t"] = jax.random.uniform(k5, (cdim, hdim), jnp.float32, -scale, scale)
    params["l_last_b"] = jax.random.uniform(k6, (1, hdim), jnp.float32, -scale, scale)
    return params


def skip_lstm_espnet_forward(params, xpad, ilens, *,
                             compute_dtype=jnp.bfloat16,
                             time_block=16,
                             n_batch_blocks=1):
    """xpad: (B, T, idim) float32; ilens: python list of lengths, descending."""
    cdt = compute_dtype
    B, T, _ = xpad.shape
    if int(ilens[0]) != T:                       # static narrow, as in PyTorch forward
        T = int(ilens[0])
        xpad = xpad[:, :T, :]

    C = params["lstm"][0][1].shape[0]            # whh: (C, 4C)
    H = params["l_last_w_t"].shape[1]
    C_p = _round_up(C, 128)                      # lane-aligned gate/cell dim
    H_p = _round_up(H, 128)                      # lane-dense projection output
    B_p = _round_up(B, 8 * n_batch_blocks)       # full sublanes / per-core batch blocks
    T_p = _round_up(T, time_block)

    # Pad batch & time once, go time-major once (no per-layer swapaxes).
    x = jnp.pad(xpad, ((0, B_p - B), (0, T_p - T), (0, 0)))
    h_stream = jnp.swapaxes(x, 0, 1).astype(cdt)             # (T_p, B_p, idim)

    for li, (wih, whh, bias) in enumerate(params["lstm"]):
        # Gate-blocked padding so each i/f/g/o slice is a full-128-lane view.
        wih_p = _pad_gate_last(wih, C, C_p)
        if li > 0:
            wih_p = jnp.pad(wih_p, ((0, C_p - C), (0, 0)))   # accept padded C_p input
        b_p = _pad_gate_last(bias, C, C_p).astype(jnp.float32)
        whh_p = jnp.pad(_pad_gate_last(whh, C, C_p), ((0, C_p - C), (0, 0)))

        # (1) Hoisted input projection over ALL timesteps: one big pipelined matmul.
        d_in = h_stream.shape[-1]
        gx = linear_pallas(h_stream.reshape(T_p * B_p, d_in),
                           wih_p.astype(cdt), b_p, out_dtype=cdt)
        gx = gx.reshape(T_p, B_p, 4 * C_p)

        # (2) Recurrence: only h @ W_hh per step, TT steps per grid iteration.
        h_stream = lstm_recurrence_pallas(gx, whh_p.astype(cdt),
                                          time_block=time_block,
                                          n_batch_blocks=n_batch_blocks,
                                          out_dtype=cdt)
        # TODO(synk): inter-layer dropout omitted (eval forward).

    ys = jnp.swapaxes(h_stream, 0, 1)                        # (B_p, T_p, C_p)

    lw_p = jnp.pad(params["l_last_w_t"], ((0, C_p - C), (0, H_p - H))).astype(cdt)
    lb_p = jnp.pad(params["l_last_b"], ((0, 0), (0, H_p - H))).astype(jnp.float32)
    lens = jnp.zeros((B_p,), jnp.int32).at[:B].set(jnp.asarray(ilens, jnp.int32))

    proj = masked_projection_pallas(lens, ys, lw_p, lb_p,
                                    t_tile=_divisor_tile(T_p, 128))
    return proj[:B, :T, :H], ilens


# ----------------------------------------------------------------------------
# Pure-JAX f32 reference (verification only)
# ----------------------------------------------------------------------------
def _ref_forward(params, xpad, ilens, cdim):
    B, T, _ = xpad.shape
    lens = jnp.asarray(ilens, dtype=jnp.int32)
    mask = (jnp.arange(T)[None, :] < lens[:, None]).astype(jnp.float32)[:, :, None]

    def run_layer(x, wih_t, whh_t, b):
        C = whh_t.shape[0]

        def step(carry, xt):
            h, c = carry
            g = xt @ wih_t + h @ whh_t + b
            i = jax.nn.sigmoid(g[:, :C])
            f = jax.nn.sigmoid(g[:, C:2 * C])
            gg = jnp.tanh(g[:, 2 * C:3 * C])
            o = jax.nn.sigmoid(g[:, 3 * C:])
            c = f * c + i * gg
            h = o * jnp.tanh(c)
            return (h, c), h

        init = (jnp.zeros((B, C), jnp.float32), jnp.zeros((B, C), jnp.float32))
        _, ys = jax.lax.scan(step, init, jnp.swapaxes(x, 0, 1))
        return jnp.swapaxes(ys, 0, 1)

    h = xpad
    for (wih_t, whh_t, b) in params["lstm"]:
        h = run_layer(h, wih_t, whh_t, b)
    ypad = mask * h
    proj = jnp.tanh(ypad.reshape(-1, cdim) @ params["l_last_w_t"] + params["l_last_b"])
    return proj.reshape(B, T, -1)


if __name__ == "__main__":
    B, T, IDIM = 2, 8, 16
    ELAYERS, CDIM, HDIM = 2, 32, 32

    key = jax.random.PRNGKey(0)
    kx, kp = jax.random.split(key)
    xpad = jax.random.normal(kx, (B, T, IDIM), dtype=jnp.float32)
    ilens = [8, 6]  # descending, ilens[0] == T

    params = init_params(kp, IDIM, ELAYERS, CDIM, HDIM)
    ref = _ref_forward(params, xpad, ilens, CDIM)

    # Primary (bf16 streams, f32 accumulation/state) — per perf review.
    out_bf16, out_ilens = skip_lstm_espnet_forward(
        params, xpad, ilens, compute_dtype=jnp.bfloat16)
    out_bf16 = jax.block_until_ready(out_bf16)
    assert out_bf16.shape == (B, T, HDIM)
    np.testing.assert_allclose(np.asarray(out_bf16), np.asarray(ref),
                               rtol=3e-2, atol=3e-2)

    # Full-f32 path sanity check of the same kernels.
    out_f32, _ = skip_lstm_espnet_forward(
        params, xpad, ilens, compute_dtype=jnp.float32)
    out_f32 = jax.block_until_ready(out_f32)
    np.testing.assert_allclose(np.asarray(out_f32), np.asarray(ref),
                               rtol=2e-2, atol=2e-2)

    print("KERNEL_OK")
</pallas_src>

<mosaic_0001>
module attributes {stable_mosaic.version = 11 : i64} {
  func.func @_linear_kernel(%arg0: i32, %arg1: memref<128x16xbf16, #tpu.memory_space<vmem>>, %arg2: memref<16x512xbf16, #tpu.memory_space<vmem>>, %arg3: memref<1x512xf32, #tpu.memory_space<vmem>>, %arg4: memref<128x512xbf16, #tpu.memory_space<vmem>>) attributes {dimension_semantics = [#tpu.dimension_semantics<parallel>], iteration_bounds = array<i64: 1>, scalar_prefetch = 0 : i64, scratch_operands = 0 : i64, tpu.core_type = #tpu.core_type<tc>, window_params = [{transform_indices = @transform_0, window_bounds = array<i64: 128, 16>}, {pipeline_mode = #tpu.pipeline_mode<synchronous>, transform_indices = @transform_1, window_bounds = array<i64: 16, 512>}, {pipeline_mode = #tpu.pipeline_mode<synchronous>, transform_indices = @transform_2, window_bounds = array<i64: 1, 512>}, {transform_indices = @transform_3, window_bounds = array<i64: 128, 512>}]} {
    %c0 = arith.constant 0 : index
    %c0_0 = arith.constant 0 : index
    %0 = vector.load %arg1[%c0, %c0_0] : memref<128x16xbf16, #tpu.memory_space<vmem>>, vector<128x16xbf16>
    %c0_1 = arith.constant 0 : index
    %c0_2 = arith.constant 0 : index
    %1 = vector.load %arg2[%c0_1, %c0_2] : memref<16x512xbf16, #tpu.memory_space<vmem>>, vector<16x512xbf16>
    %cst = arith.constant dense<0.000000e+00> : vector<128x512xf32>
    %2 = tpu.matmul %0, %1, %cst {dimension_numbers = #tpu.dot_dimension_numbers<[1], [0], [0], [1], [0, 0, 1, 1], [], []>} : vector<128x16xbf16>, vector<16x512xbf16>, vector<128x512xf32> -> vector<128x512xf32>
    %c0_3 = arith.constant 0 : index
    %c0_4 = arith.constant 0 : index
    %3 = vector.load %arg3[%c0_3, %c0_4] : memref<1x512xf32, #tpu.memory_space<vmem>>, vector<1x512xf32>
    %4 = vector.broadcast %3 : vector<1x512xf32> to vector<128x512xf32>
    %5 = arith.addf %2, %4 : vector<128x512xf32>
    %6 = arith.truncf %5 : vector<128x512xf32> to vector<128x512xbf16>
    %c0_5 = arith.constant 0 : index
    %c0_6 = arith.constant 0 : index
    %7 = vector.load %arg4[%c0_5, %c0_6] : memref<128x512xbf16, #tpu.memory_space<vmem>>, vector<128x512xbf16>
    tpu.vector_store %arg4[%c0_5, %c0_6], %6 {strides = array<i32>} : memref<128x512xbf16, #tpu.memory_space<vmem>>, vector<128x512xbf16>,
    return
  }
  func.func @transform_0(%arg0: i32) -> (i32, i32) {
    %c0_i32 = arith.constant 0 : i32
    %c0_i32_0 = arith.constant 0 : i32
    return %arg0, %c0_i32 : i32, i32
  }
  func.func @transform_1(%arg0: i32) -> (i32, i32) {
    %c0_i32 = arith.constant 0 : i32
    %c0_i32_0 = arith.constant 0 : i32
    %c0_i32_1 = arith.constant 0 : i32
    return %c0_i32, %c0_i32_0 : i32, i32
  }
  func.func @transform_2(%arg0: i32) -> (i32, i32) {
    %c0_i32 = arith.constant 0 : i32
    %c0_i32_0 = arith.constant 0 : i32
    %c0_i32_1 = arith.constant 0 : i32
    return %c0_i32, %c0_i32_0 : i32, i32
  }
  func.func @transform_3(%arg0: i32) -> (i32, i32) {
    %c0_i32 = arith.constant 0 : i32
    %c0_i32_0 = arith.constant 0 : i32
    return %arg0, %c0_i32 : i32, i32
  }
}

</mosaic_0001>

<bundles_post_ra>
// kernel: tpu_custom_call.1
= control target key start
LH: loop header
LB: loop body
LE: loop exit
PB: predicated region body
PF: predicated region fallthrough
CT: control target
= control target key end

     0   :  { %v741_v2 = vmov 0   ;;  %vm118_vm0 = vcmask 130048   ;;  %s895_s0 = inlined_call_operand.vmem [shape: bf16[128,16], index: 0, kind: input, shape index: {}]   ;;  %s896_s1 = inlined_call_operand.vmem [shape: bf16[16,512], index: 1, kind: input, shape index: {}]   ;;  %s897_s2 = inlined_call_operand.vmem [shape: f32[1,512], index: 2, kind: input, shape index: {}]   ;;  %s898_s3 = inlined_call_operand.hbm [shape: bf16[128,512], index: 3, kind: output, shape index: {}]  }
   0x1   :  { %v705_v0 = vld [vmem:[%s896_s1 + $0x4] ss:$16 sps:$4 sm:$0xff]   ;;  %v707_v1 = vld [vmem:[%s896_s1 + $0xc] ss:$16 sps:$4 sm:$0xff]   ;;  %175 = vmatprep.mubr.bf16.mxu0 %v741_v2  ;;  %288 = vmatprep.mubr.bf16.mxu1 %v741_v2  ;;  %v709_v3 = vld [vmem:[%s896_s1] ss:$16 sps:$4 sm:$0xff]  }
   0x2   :  { %157 = vmatprep.subr.bf16.mxu0 %v705_v0  ;;  %v710_v4 = vld [vmem:[%s896_s1 + $0x8] ss:$16 sps:$4 sm:$0xff]   ;;  %270 = vmatprep.subr.bf16.mxu1 %v707_v1  ;;  %v711_v5 = vld [vmem:[%s895_s0] sm:$0xff]  }
   0x3   :  { %158 = vmatpush1.bf16.msra.mxu0 %v709_v3  ;;  %271 = vmatpush1.bf16.msra.mxu1 %v710_v4  ;;  %v712_v6 = vld [vmem:[%s895_s0 + $0x8] sm:$0xff]  }
   0x6   :  { %621 = vmatmul.mubr.msk.bf16.vlgmr.msra.gmra.mxu0 %vm118_vm0, %v711_v5  ;;  %629 = vmatmul.mubr.msk.bf16.vlgmr.msra.gmra.mxu1 %vm118_vm0, %v711_v5 }
   0x7   :  { %185 = vmatprep.mubr.bf16.mxu0 %v741_v2  ;;  %298 = vmatprep.mubr.bf16.mxu1 %v741_v2 }
   0x8   :  { %8 = vsyncpa [#allocation3], 0  ;;  %v713_v7 = vld [vmem:[%s895_s0 + $0x10] sm:$0xff]   ;;  %v714_v8 = vld [vmem:[%s895_s0 + $0x18] sm:$0xff]   ;;  %v38_v13 = vlaneseq }
   0x9   :  { %v715_v9 = vld [vmem:[%s895_s0 + $0x20] sm:$0xff]   ;;  %v716_v10 = vld [vmem:[%s895_s0 + $0x28] sm:$0xff]   ;;  %v717_v11 = vld [vmem:[%s895_s0 + $0x30] sm:$0xff]  }
   0xa   :  { %v718_v12 = vld [vmem:[%s895_s0 + $0x38] sm:$0xff]   ;;  %v39_v14 = vshrl.u32 %v38_v13, 7  ;;  %v36_v19 = vld [vmem:[%s897_s2] sm:$0xf]  ;;  %s742_s0 = smov [#allocation2]  }
   0xb   :  { %s598_s2 = sshll.u32 %s742_s0, 4  ;;  %s599_s2 = int_to_ptr.vmem [resolvable:$true] %s598_s2 }
   0xc   :  { %v40_v15 = vsub.s32 0, %v39_v14  ;;  %v48_v16 = vsub.s32 2, %v39_v14  ;;  %v44_v17 = vsub.s32 1, %v39_v14  ;;  %v52_v18 = vsub.s32 3, %v39_v14  ;;  %s719_s10 = scalar_lea.vmem %s599_s2, 4096  ;;  %p724_p1 = scmp.lt.s32.totalorder %s599_s2, %s599_s2 }
   0xd   :  { %p720_p0 = scmp.ne.s32.totalorder %s599_s2, %s719_s10  ;;  %p725_p2 = scmp.lt.s32.totalorder %s719_s10, %s719_s10 }
   0xe   :  { %622 = vmatmul.mubr.msk.bf16.gmra.mxu0 %vm118_vm0, %v712_v6  ;;  %630 = vmatmul.mubr.msk.bf16.gmra.mxu1 %vm118_vm0, %v712_v6  ;;  %v820_v20 = vrot.slane %v36_v19, %v40_v15  ;;  %v822_v21 = vrot.slane %v36_v19, %v48_v16  ;;  %v824_v22 = vrot.slane %v36_v19, %v44_v17 }
   0xf   :  { %195 = vmatprep.mubr.bf16.mxu0 %v741_v2  ;;  %308 = vmatprep.mubr.bf16.mxu1 %v741_v2  ;;  %v826_v23 = vrot.slane %v36_v19, %v52_v18  ;;  %p726_p3 = por %p725_p2, %p724_p1 }
  0x11   :  { %p727_p4 = pnand %p726_p3, %p720_p0 }
  0x16   :  { %623 = vmatmul.mubr.msk.bf16.gmra.mxu0 %vm118_vm0, %v713_v7  ;;  %631 = vmatmul.mubr.msk.bf16.gmra.mxu1 %vm118_vm0, %v713_v7 }
  0x17   :  { %205 = vmatprep.mubr.bf16.mxu0 %v741_v2  ;;  %318 = vmatprep.mubr.bf16.mxu1 %v741_v2 }
  0x1e   :  { %624 = vmatmul.mubr.msk.bf16.gmra.mxu0 %vm118_vm0, %v714_v8  ;;  %632 = vmatmul.mubr.msk.bf16.gmra.mxu1 %vm118_vm0, %v714_v8 }
  0x1f   :  { %215 = vmatprep.mubr.bf16.mxu0 %v741_v2  ;;  %328 = vmatprep.mubr.bf16.mxu1 %v741_v2 }
  0x26   :  { %625 = vmatmul.mubr.msk.bf16.gmra.mxu0 %vm118_vm0, %v715_v9  ;;  %633 = vmatmul.mubr.msk.bf16.gmra.mxu1 %vm118_vm0, %v715_v9 }
  0x27   :  { %225 = vmatprep.mubr.bf16.mxu0 %v741_v2  ;;  %338 = vmatprep.mubr.bf16.mxu1 %v741_v2 }
  0x2e   :  { %626 = vmatmul.mubr.msk.bf16.gmra.mxu0 %vm118_vm0, %v716_v10  ;;  %634 = vmatmul.mubr.msk.bf16.gmra.mxu1 %vm118_vm0, %v716_v10 }
  0x2f   :  { %235 = vmatprep.mubr.bf16.mxu0 %v741_v2  ;;  %348 = vmatprep.mubr.bf16.mxu1 %v741_v2 }
  0x36   :  { %627 = vmatmul.mubr.msk.bf16.gmra.mxu0 %vm118_vm0, %v717_v11  ;;  %635 = vmatmul.mubr.msk.bf16.gmra.mxu1 %vm118_vm0, %v717_v11 }
  0x37   :  { %245 = vmatprep.mubr.bf16.mxu0 %v741_v2  ;;  %358 = vmatprep.mubr.bf16.mxu1 %v741_v2 }
  0x3e   :  { %628 = vmatmul.mubr.msk.bf16.gmra.mxu0 %vm118_vm0, %v718_v12  ;;  %636 = vmatmul.mubr.msk.bf16.gmra.mxu1 %vm118_vm0, %v718_v12 }
  0xc6   :  { %v177_v24 = vpop.f32.mrf.mxu0  ;;  %v290_v25 = vpop.f32.mrf.mxu1 }
  0xc7   :  { %v178_v28 = vadd.f32 %v177_v24, %v820_v20  ;;  %v291_v29 = vadd.f32 %v290_v25, %v822_v21 }
  0xc8   :  { %v179_v26 = vpop.f32.mrf.mxu0  ;;  %v292_v27 = vpop.f32.mrf.mxu1 }
  0xc9   :  { %v180_v30 = vadd.f32 %v179_v26, %v824_v22  ;;  %v293_v31 = vadd.f32 %v292_v27, %v826_v23 }
  0xca   :  { %v181_v32 = vpop.f32.mrf.mxu0  ;;  %v294_v33 = vpop.f32.mrf.mxu1 }
  0xcb   :  { %v669_v34 = vpack.c.bf16 %v180_v30, %v178_v28  ;;  %v670_v35 = vpack.c.bf16 %v293_v31, %v291_v29  ;;  %v182_v38 = vadd.f32 %v181_v32, %v820_v20  ;;  %v295_v39 = vadd.f32 %v294_v33, %v822_v21 }
  0xcc   :  { %v183_v36 = vpop.f32.mrf.mxu0  ;;  %v296_v37 = vpop.f32.mrf.mxu1 }
  0xcd   :  { %561 = vst [vmem:[#allocation2] sm:$0xff] %v669_v34  ;;  %562 = vst [vmem:[#allocation2 + $0x8] sm:$0xff] %v670_v35  ;;  %v184_v40 = vadd.f32 %v183_v36, %v824_v22  ;;  %v297_v41 = vadd.f32 %v296_v37, %v826_v23 }
  0xce   :  { %v187_v42 = vpop.f32.mrf.mxu0  ;;  %v300_v43 = vpop.f32.mrf.mxu1 }
  0xcf   :  { %v671_v44 = vpack.c.bf16 %v184_v40, %v182_v38  ;;  %v672_v45 = vpack.c.bf16 %v297_v41, %v295_v39  ;;  %v188_v48 = vadd.f32 %v187_v42, %v820_v20  ;;  %v301_v49 = vadd.f32 %v300_v43, %v822_v21 }
  0xd0   :  { %v189_v46 = vpop.f32.mrf.mxu0  ;;  %v302_v47 = vpop.f32.mrf.mxu1 }
  0xd1   :  { %563 = vst [vmem:[#allocation2 + $0x10] sm:$0xff] %v671_v44  ;;  %564 = vst [vmem:[#allocation2 + $0x18] sm:$0xff] %v672_v45  ;;  %v190_v50 = vadd.f32 %v189_v46, %v824_v22  ;;  %v303_v51 = vadd.f32 %v302_v47, %v826_v23 }
  0xd2   :  { %v191_v52 = vpop.f32.mrf.mxu0  ;;  %v304_v53 = vpop.f32.mrf.mxu1 }
  0xd3   :  { %v673_v54 = vpack.c.bf16 %v190_v50, %v188_v48  ;;  %v674_v55 = vpack.c.bf16 %v303_v51, %v301_v49  ;;  %v192_v58 = vadd.f32 %v191_v52, %v820_v20  ;;  %v305_v59 = vadd.f32 %v304_v53, %v822_v21 }
  0xd4   :  { %v193_v56 = vpop.f32.mrf.mxu0  ;;  %v306_v57 = vpop.f32.mrf.mxu1 }
  0xd5   :  { %565 = vst [vmem:[#allocation2 + $0x20] sm:$0xff] %v673_v54  ;;  %566 = vst [vmem:[#allocation2 + $0x28] sm:$0xff] %v674_v55  ;;  %v194_v60 = vadd.f32 %v193_v56, %v824_v22  ;;  %v307_v61 = vadd.f32 %v306_v57, %v826_v23 }
  0xd6   :  { %v197_v62 = vpop.f32.mrf.mxu0  ;;  %v310_v63 = vpop.f32.mrf.mxu1 }
  0xd7   :  { %v675_v0 = vpack.c.bf16 %v194_v60, %v192_v58  ;;  %v676_v1 = vpack.c.bf16 %v307_v61, %v305_v59  ;;  %v198_v4 = vadd.f32 %v197_v62, %v820_v20  ;;  %v311_v5 = vadd.f32 %v310_v63, %v822_v21 }
  0xd8   :  { %v199_v2 = vpop.f32.mrf.mxu0  ;;  %v312_v3 = vpop.f32.mrf.mxu1 }
  0xd9   :  { %567 = vst [vmem:[#allocation2 + $0x30] sm:$0xff] %v675_v0  ;;  %568 = vst [vmem:[#allocation2 + $0x38] sm:$0xff] %v676_v1  ;;  %v200_v6 = vadd.f32 %v199_v2, %v824_v22  ;;  %v313_v7 = vadd.f32 %v312_v3, %v826_v23 }
  0xda   :  { %v201_v8 = vpop.f32.mrf.mxu0  ;;  %v314_v9 = vpop.f32.mrf.mxu1 }
  0xdb   :  { %v677_v10 = vpack.c.bf16 %v200_v6, %v198_v4  ;;  %v678_v11 = vpack.c.bf16 %v313_v7, %v311_v5  ;;  %v202_v14 = vadd.f32 %v201_v8, %v820_v20  ;;  %v315_v15 = vadd.f32 %v314_v9, %v822_v21 }
  0xdc   :  { %v203_v12 = vpop.f32.mrf.mxu0  ;;  %v316_v13 = vpop.f32.mrf.mxu1 }
  0xdd   :  { %569 = vst [vmem:[#allocation2 + $0x40] sm:$0xff] %v677_v10  ;;  %570 = vst [vmem:[#allocation2 + $0x48] sm:$0xff] %v678_v11  ;;  %v204_v16 = vadd.f32 %v203_v12, %v824_v22  ;;  %v317_v17 = vadd.f32 %v316_v13, %v826_v23 }
  0xde   :  { %v207_v18 = vpop.f32.mrf.mxu0  ;;  %v320_v19 = vpop.f32.mrf.mxu1 }
  0xdf   :  { %v679_v24 = vpack.c.bf16 %v204_v16, %v202_v14  ;;  %v680_v25 = vpack.c.bf16 %v317_v17, %v315_v15  ;;  %v208_v28 = vadd.f32 %v207_v18, %v820_v20  ;;  %v321_v29 = vadd.f32 %v320_v19, %v822_v21 }
  0xe0   :  { %v209_v26 = vpop.f32.mrf.mxu0  ;;  %v322_v27 = vpop.f32.mrf.mxu1 }
  0xe1   :  { %571 = vst [vmem:[#allocation2 + $0x50] sm:$0xff] %v679_v24  ;;  %572 = vst [vmem:[#allocation2 + $0x58] sm:$0xff] %v680_v25  ;;  %v210_v30 = vadd.f32 %v209_v26, %v824_v22  ;;  %v323_v31 = vadd.f32 %v322_v27, %v826_v23 }
  0xe2   :  { %v211_v32 = vpop.f32.mrf.mxu0  ;;  %v324_v33 = vpop.f32.mrf.mxu1 }
  0xe3   :  { %v681_v34 = vpack.c.bf16 %v210_v30, %v208_v28  ;;  %v682_v35 = vpack.c.bf16 %v323_v31, %v321_v29  ;;  %v212_v38 = vadd.f32 %v211_v32, %v820_v20  ;;  %v325_v39 = vadd.f32 %v324_v33, %v822_v21 }
  0xe4   :  { %v213_v36 = vpop.f32.mrf.mxu0  ;;  %v326_v37 = vpop.f32.mrf.mxu1 }
  0xe5   :  { %573 = vst [vmem:[#allocation2 + $0x60] sm:$0xff] %v681_v34  ;;  %574 = vst [vmem:[#allocation2 + $0x68] sm:$0xff] %v682_v35  ;;  %v214_v40 = vadd.f32 %v213_v36, %v824_v22  ;;  %v327_v41 = vadd.f32 %v326_v37, %v826_v23 }
  0xe6   :  { %v217_v42 = vpop.f32.mrf.mxu0  ;;  %v330_v43 = vpop.f32.mrf.mxu1 }
  0xe7   :  { %v683_v44 = vpack.c.bf16 %v214_v40, %v212_v38  ;;  %v684_v45 = vpack.c.bf16 %v327_v41, %v325_v39  ;;  %v218_v48 = vadd.f32 %v217_v42, %v820_v20  ;;  %v331_v49 = vadd.f32 %v330_v43, %v822_v21 }
  0xe8   :  { %v219_v46 = vpop.f32.mrf.mxu0  ;;  %v332_v47 = vpop.f32.mrf.mxu1 }
  0xe9   :  { %575 = vst [vmem:[#allocation2 + $0x70] sm:$0xff] %v683_v44  ;;  %576 = vst [vmem:[#allocation2 + $0x78] sm:$0xff] %v684_v45  ;;  %v220_v50 = vadd.f32 %v219_v46, %v824_v22  ;;  %v333_v51 = vadd.f32 %v332_v47, %v826_v23 }
  0xea   :  { %v221_v52 = vpop.f32.mrf.mxu0  ;;  %v334_v53 = vpop.f32.mrf.mxu1 }
  0xeb   :  { %v685_v54 = vpack.c.bf16 %v220_v50, %v218_v48  ;;  %v686_v55 = vpack.c.bf16 %v333_v51, %v331_v49  ;;  %v222_v58 = vadd.f32 %v221_v52, %v820_v20  ;;  %v335_v59 = vadd.f32 %v334_v53, %v822_v21 }
  0xec   :  { %v223_v56 = vpop.f32.mrf.mxu0  ;;  %v336_v57 = vpop.f32.mrf.mxu1 }
  0xed   :  { %577 = vst [vmem:[#allocation2 + $0x80] sm:$0xff] %v685_v54  ;;  %578 = vst [vmem:[#allocation2 + $0x88] sm:$0xff] %v686_v55  ;;  %v224_v60 = vadd.f32 %v223_v56, %v824_v22  ;;  %v337_v61 = vadd.f32 %v336_v57, %v826_v23 }
  0xee   :  { %v227_v62 = vpop.f32.mrf.mxu0  ;;  %v340_v63 = vpop.f32.mrf.mxu1 }
  0xef   :  { %v687_v0 = vpack.c.bf16 %v224_v60, %v222_v58  ;;  %v688_v1 = vpack.c.bf16 %v337_v61, %v335_v59  ;;  %v228_v4 = vadd.f32 %v227_v62, %v820_v20  ;;  %v341_v5 = vadd.f32 %v340_v63, %v822_v21 }
  0xf0   :  { %v229_v2 = vpop.f32.mrf.mxu0  ;;  %v342_v3 = vpop.f32.mrf.mxu1 }
  0xf1   :  { %579 = vst [vmem:[#allocation2 + $0x90] sm:$0xff] %v687_v0  ;;  %580 = vst [vmem:[#allocation2 + $0x98] sm:$0xff] %v688_v1  ;;  %v230_v6 = vadd.f32 %v229_v2, %v824_v22  ;;  %v343_v7 = vadd.f32 %v342_v3, %v826_v23 }
  0xf2   :  { %v231_v8 = vpop.f32.mrf.mxu0  ;;  %v344_v9 = vpop.f32.mrf.mxu1 }
  0xf3   :  { %v689_v10 = vpack.c.bf16 %v230_v6, %v228_v4  ;;  %v690_v11 = vpack.c.bf16 %v343_v7, %v341_v5  ;;  %v232_v14 = vadd.f32 %v231_v8, %v820_v20  ;;  %v345_v15 = vadd.f32 %v344_v9, %v822_v21 }
  0xf4   :  { %v233_v12 = vpop.f32.mrf.mxu0  ;;  %v346_v13 = vpop.f32.mrf.mxu1 }
  0xf5   :  { %581 = vst [vmem:[#allocation2 + $0xa0] sm:$0xff] %v689_v10  ;;  %582 = vst [vmem:[#allocation2 + $0xa8] sm:$0xff] %v690_v11  ;;  %v234_v16 = vadd.f32 %v233_v12, %v824_v22  ;;  %v347_v17 = vadd.f32 %v346_v13, %v826_v23 }
  0xf6   :  { %v237_v18 = vpop.f32.mrf.mxu0  ;;  %v350_v19 = vpop.f32.mrf.mxu1 }
  0xf7   :  { %v691_v24 = vpack.c.bf16 %v234_v16, %v232_v14  ;;  %v692_v25 = vpack.c.bf16 %v347_v17, %v345_v15  ;;  %v238_v28 = vadd.f32 %v237_v18, %v820_v20  ;;  %v351_v29 = vadd.f32 %v350_v19, %v822_v21 }
  0xf8   :  { %v239_v26 = vpop.f32.mrf.mxu0  ;;  %v352_v27 = vpop.f32.mrf.mxu1 }
  0xf9   :  { %583 = vst [vmem:[#allocation2 + $0xb0] sm:$0xff] %v691_v24  ;;  %584 = vst [vmem:[#allocation2 + $0xb8] sm:$0xff] %v692_v25  ;;  %v240_v30 = vadd.f32 %v239_v26, %v824_v22  ;;  %v353_v31 = vadd.f32 %v352_v27, %v826_v23 }
  0xfa   :  { %v241_v32 = vpop.f32.mrf.mxu0  ;;  %v354_v33 = vpop.f32.mrf.mxu1 }
  0xfb   :  { %v693_v34 = vpack.c.bf16 %v240_v30, %v238_v28  ;;  %v694_v35 = vpack.c.bf16 %v353_v31, %v351_v29  ;;  %v242_v38 = vadd.f32 %v241_v32, %v820_v20  ;;  %v355_v39 = vadd.f32 %v354_v33, %v822_v21 }
  0xfc   :  { %v243_v36 = vpop.f32.mrf.mxu0  ;;  %v356_v37 = vpop.f32.mrf.mxu1 }
  0xfd   :  { %585 = vst [vmem:[#allocation2 + $0xc0] sm:$0xff] %v693_v34  ;;  %586 = vst [vmem:[#allocation2 + $0xc8] sm:$0xff] %v694_v35  ;;  %v244_v40 = vadd.f32 %v243_v36, %v824_v22  ;;  %v357_v41 = vadd.f32 %v356_v37, %v826_v23 }
  0xfe   :  { %v247_v42 = vpop.f32.mrf.mxu0  ;;  %v360_v43 = vpop.f32.mrf.mxu1 }
  0xff   :  { %v695_v44 = vpack.c.bf16 %v244_v40, %v242_v38  ;;  %v696_v45 = vpack.c.bf16 %v357_v41, %v355_v39  ;;  %v248_v48 = vadd.f32 %v247_v42, %v820_v20  ;;  %v361_v49 = vadd.f32 %v360_v43, %v822_v21 }
 0x100   :  { %v249_v46 = vpop.f32.mrf.mxu0  ;;  %v362_v47 = vpop.f32.mrf.mxu1 }
 0x101   :  { %587 = vst [vmem:[#allocation2 + $0xd0] sm:$0xff] %v695_v44  ;;  %588 = vst [vmem:[#allocation2 + $0xd8] sm:$0xff] %v696_v45  ;;  %v250_v50 = vadd.f32 %v249_v46, %v824_v22  ;;  %v363_v51 = vadd.f32 %v362_v47, %v826_v23 }
 0x102   :  { %v251_v52 = vpop.f32.mrf.mxu0  ;;  %v364_v53 = vpop.f32.mrf.mxu1 }
 0x103   :  { %v697_v54 = vpack.c.bf16 %v250_v50, %v248_v48  ;;  %v698_v55 = vpack.c.bf16 %v363_v51, %v361_v49  ;;  %v252_v58 = vadd.f32 %v251_v52, %v820_v20  ;;  %v365_v59 = vadd.f32 %v364_v53, %v822_v21 }
 0x104   :  { %v253_v56 = vpop.f32.mrf.mxu0  ;;  %v366_v57 = vpop.f32.mrf.mxu1 }
 0x105   :  { %589 = vst [vmem:[#allocation2 + $0xe0] sm:$0xff] %v697_v54  ;;  %590 = vst [vmem:[#allocation2 + $0xe8] sm:$0xff] %v698_v55  ;;  %v254_v60 = vadd.f32 %v253_v56, %v824_v22  ;;  %v367_v61 = vadd.f32 %v366_v57, %v826_v23 }
 0x107   :  { %v699_v62 = vpack.c.bf16 %v254_v60, %v252_v58  ;;  %v700_v63 = vpack.c.bf16 %v367_v61, %v365_v59 }
 0x109   :  { %591 = vst [vmem:[#allocation2 + $0xf0] sm:$0xff] %v699_v62  ;;  %592 = vst [vmem:[#allocation2 + $0xf8] sm:$0xff] %v700_v63 }
 0x10a   :  { %730 = shalt.err (!%p727_p4)
}
 0x10b   :  { %s743_s11 = smov 256   ;;  %s744_s12 = smov 16  }
 0x10c   :  { %604 = dma.vmem_to_hbm [thread:$0]  %s599_s2, 4096, %s898_s3, [#allocation3], %s743_s11, %s743_s11, %s744_s12  }
 0x10d   :  { %739 = dma.done.wait [#allocation3], 4096  }
 0x10e   :  { %740 = vsyncadd [#allocation3], 4294963200 }
 0x10f   :  { %608 = vsyncpa [#allocation3], 1 }

</bundles_post_ra>
